<compile_context>
chip_gen: v5e
topology: v5e:2x2
jax: 0.10.0
libtpu: 0.0.40
codegen_flags: <defaults>
</compile_context>

<pallas_src>
import math
from functools import partial

import jax
import jax.numpy as jnp
from jax.experimental import pallas as pl
from jax.experimental.pallas import tpu as pltpu


_LANES = 128                            # vreg lane width
_TARGET_BLOCK_BYTES = 2 * 1024 * 1024   # ~2 MiB blocks: mem-bound sweet spot


def _drop_path_kernel(scale_ref, x_ref, o_ref):
    # scale_ref: SMEM (B,) float32, prefetched; scale_ref[b] is either
    #            0.0 (path dropped) or 1/keep_prob (path kept).
    # x_ref/o_ref: VMEM block (1, tile_r, 128) of the flattened sample.
    b = pl.program_id(0)
    s = scale_ref[b]                                   # f32 scalar (SMEM read)
    o_ref[...] = (x_ref[...].astype(jnp.float32) * s).astype(o_ref.dtype)


@jax.jit
def _drop_path_pallas(x, scale):
    orig_shape = x.shape
    B = orig_shape[0]
    N = math.prod(orig_shape[1:])

    # Flatten to lane-dense (B, N); pad the per-sample axis to a multiple of
    # 128 lanes only when needed (C*H*W is almost always already a multiple).
    x2 = x.reshape(B, N)
    pad = (-N) % _LANES
    if pad:
        # TODO(synk): this pad costs one extra HBM copy; only hit when
        # C*H*W % 128 != 0.
        x2 = jnp.pad(x2, ((0, 0), (0, pad)))
    n_padded = N + pad
    rows = n_padded // _LANES
    x3 = x2.reshape(B, rows, _LANES)

    # Tile the per-sample axis: aim for ~2 MiB blocks, sublane-aligned (x8).
    itemsize = jnp.dtype(x.dtype).itemsize
    target_rows = max(8, (_TARGET_BLOCK_BYTES // (_LANES * itemsize)) // 8 * 8)
    tile_r = rows if rows <= target_rows else target_rows
    n_tiles = pl.cdiv(rows, tile_r)

    block = (1, tile_r, _LANES)
    out3 = pl.pallas_call(
        _drop_path_kernel,
        out_shape=jax.ShapeDtypeStruct((B, rows, _LANES), x.dtype),
        grid_spec=pltpu.PrefetchScalarGridSpec(
            num_scalar_prefetch=1,          # scale -> SMEM
            grid=(B, n_tiles),
            in_specs=[
                pl.BlockSpec(block, lambda b, t, scale: (b, t, 0)),
            ],
            out_specs=pl.BlockSpec(block, lambda b, t, scale: (b, t, 0)),
        ),
        compiler_params=pltpu.CompilerParams(
            dimension_semantics=("parallel", "parallel"),
            vmem_limit_bytes=32 * 1024 * 1024,
        ),
    )(scale, x3)

    out = out3.reshape(B, n_padded)
    if pad:
        out = out[:, :N]
    return out.reshape(orig_shape)


def drop_path(x, key, drop_prob: float = 0.0, training: bool = False):
    """Matches torch drop_path semantics.

    random_tensor = floor(keep_prob + U[0,1))  (per sample, broadcast over
    all non-batch dims);  out = x / keep_prob * random_tensor.
    """
    if drop_prob == 0.0 or not training:
        return x
    keep_prob = 1.0 - drop_prob
    B = x.shape[0]
    # Per-sample Bernoulli(keep_prob) keep mask, exactly as torch:
    # floor(keep_prob + uniform). Fold the 1/keep_prob scaling in here so the
    # kernel does a single multiply.
    u = jax.random.uniform(key, (B,), dtype=jnp.float32)
    random_tensor = jnp.floor(keep_prob + u)           # 0.0 or 1.0
    scale = (random_tensor / keep_prob).astype(jnp.float32)
    return _drop_path_pallas(x, scale)


class DropPath:
    """JAX/Pallas counterpart of the PyTorch DropPath module."""

    def __init__(self, drop_prob=None):
        self.drop_prob = drop_prob if drop_prob is not None else 0.0
        self.training = True

    def __call__(self, x, key):
        return drop_path(x, key, self.drop_prob, self.training)


if __name__ == "__main__":
    key = jax.random.PRNGKey(0)
    kx, kmask = jax.random.split(key)

    B, C, H, W = 2, 4, 16, 16
    x = jax.random.normal(kx, (B, C, H, W), dtype=jnp.float32)

    module = DropPath(drop_prob=0.5)
    module.training = True
    out = module(x, kmask)
    out = jax.block_until_ready(out)

    # Reference check against pure-JAX drop_path with the same mask draw.
    keep_prob = 1.0 - module.drop_prob
    u = jax.random.uniform(kmask, (B,), dtype=jnp.float32)
    random_tensor = jnp.floor(keep_prob + u).reshape(B, 1, 1, 1)
    ref = (x / keep_prob) * random_tensor
    assert jnp.allclose(out, ref, atol=1e-6), "mismatch vs reference"

    # Eval / drop_prob=0 path: identity.
    module.training = False
    out_eval = jax.block_until_ready(module(x, kmask))
    assert jnp.array_equal(out_eval, x)

    print("KERNEL_OK")
</pallas_src>

<mosaic_0001>
module attributes {stable_mosaic.version = 11 : i64} {
  func.func @_drop_path_kernel(%arg0: i32, %arg1: i32, %arg2: memref<2xf32, #tpu.memory_space<smem>>, %arg3: memref<1x8x128xf32, #tpu.memory_space<vmem>>, %arg4: memref<1x8x128xf32, #tpu.memory_space<vmem>>) attributes {dimension_semantics = [#tpu.dimension_semantics<parallel>, #tpu.dimension_semantics<parallel>], iteration_bounds = array<i64: 2, 1>, scalar_prefetch = 1 : i64, scratch_operands = 0 : i64, tpu.core_type = #tpu.core_type<tc>, window_params = [{transform_indices = @transform_0, window_bounds = array<i64: 1, 8, 128>}, {transform_indices = @transform_1, window_bounds = array<i64: 1, 8, 128>}]} {
    %0 = arith.index_cast %arg0 : i32 to index
    %1 = memref.load %arg2[%0] : memref<2xf32, #tpu.memory_space<smem>>
    %c0 = arith.constant 0 : index
    %c0_0 = arith.constant 0 : index
    %c0_1 = arith.constant 0 : index
    %2 = vector.load %arg3[%c0, %c0_0, %c0_1] : memref<1x8x128xf32, #tpu.memory_space<vmem>>, vector<1x8x128xf32>
    %3 = vector.broadcast %1 : f32 to vector<1x8x128xf32>
    %4 = arith.mulf %2, %3 : vector<1x8x128xf32>
    %c0_2 = arith.constant 0 : index
    %c0_3 = arith.constant 0 : index
    %c0_4 = arith.constant 0 : index
    %5 = vector.load %arg4[%c0_2, %c0_3, %c0_4] : memref<1x8x128xf32, #tpu.memory_space<vmem>>, vector<1x8x128xf32>
    tpu.vector_store %arg4[%c0_2, %c0_3, %c0_4], %4 {strides = array<i32>} : memref<1x8x128xf32, #tpu.memory_space<vmem>>, vector<1x8x128xf32>,
    return
  }
  func.func @transform_0(%arg0: i32, %arg1: i32, %arg2: memref<2xf32, #tpu.memory_space<smem>>) -> (i32, i32, i32) {
    %c0_i32 = arith.constant 0 : i32
    %c0_i32_0 = arith.constant 0 : i32
    return %arg0, %arg1, %c0_i32 : i32, i32, i32
  }
  func.func @transform_1(%arg0: i32, %arg1: i32, %arg2: memref<2xf32, #tpu.memory_space<smem>>) -> (i32, i32, i32) {
    %c0_i32 = arith.constant 0 : i32
    %c0_i32_0 = arith.constant 0 : i32
    return %arg0, %arg1, %c0_i32 : i32, i32, i32
  }
}

</mosaic_0001>

<bundles_post_ra>
// kernel: _drop_path_pallas.1
= control target key start
LH: loop header
LB: loop body
LE: loop exit
PB: predicated region body
PF: predicated region fallthrough
CT: control target
= control target key end

     0   :  { %s303_s12 = smov [#allocation3]   ;;  %s338_s0 = inlined_call_operand.vmem [shape: f32[2], index: 0, kind: input, shape index: {}]   ;;  %s339_s1 = inlined_call_operand.vmem [shape: f32[2,8,128], index: 1, kind: input, shape index: {}]   ;;  %s340_s2 = inlined_call_operand.vmem [shape: f32[2,8,128], index: 2, kind: output, shape index: {}]  }
   0x1   :  { %s8_s11 = sshll.u32 %s338_s0, 4  ;;  %s9_s11 = int_to_ptr.vmem [resolvable:$true] %s8_s11 }
   0x2   :  { %11 = dma.vmem_to_smem %s9_s11, 16, %s303_s12, [#allocation2] }
   0x3   :  { %289 = dma.done.wait [#allocation2], 16 }
   0x4   :  { %290 = vsyncadd [#allocation2], 4294967280 }
   0x5   :  { %14 = sfence }
   0x6   :  { %s322_s13 = smov 0   ;;  %s324_s14 = smov 0  }
   0x7   :  { %s299_s15 = smov 0  }
   0x8 LB: > { %s32_s16 = sadd.s32 1, %s297_s14  ;;  %p235_p0 = scmp.ge.s32.totalorder %s301_s15, 1  ;;  %s301_s15 = sphi %s299_s15, %s20_s15   ;;  %s297_s14 = sphi %s324_s14, %s342_s14   ;;  %s293_s13 = sphi %s322_s13, %s341_s13  }
   0x9   : > { %p34_p1 = scmp.ge.s32.totalorder %s32_s16, 2  ;;  %p114_p2 = scmp.lt.s32.totalorder %s301_s15, 3 }
   0xb   : > { %s344_s16 = smov (%p34_p1, %s32_s16), 0  ;;  %p115_p3 = pnand %p235_p0, %p114_p2 }
   0xc   : > { %p138_p4 = scmp.lt.s32.totalorder (!%p115_p3), %s293_s13, 1  ;;  %s152_s0 = sld [smem:[#allocation3 + %s293_s13]] (!%p115_p3) }
   0xd   : > { %118 = sbr.rel (%p115_p3) target bundleno = 25 (0x19), region = 24 }
  0x12   : > { %s346_s13 = smov (!%p138_p4, %s293_s13), 1  ;;  %v154_v1 = vstv %s152_s0 }
  0x13   : > { %s236_s17 = sshll.u32 %s346_s13, 3 }
  0x14   : > { %s144_s20 = scalar_lea.vmem %s339_s1, %s236_s17  ;;  %s151_s23 = scalar_lea.vmem %s340_s2, %s236_s17 }
  0x15   : > { %v153_v0 = vld [vmem:[%s144_s20] sm:$0xff] }
  0x16   : > { %v155_v2 = vmul.f32 %v154_v1, %v153_v0 }
  0x18   : > { %156 = vst [vmem:[%s151_s23] sm:$0xff] %v155_v2 }
  0x19 PF: > { %s20_s15 = sadd.s32 1, %s301_s15   ;;  %s341_s13 = smov %s297_s14 }
  0x1a   : > { %p17_p5 = scmp.ge.s32.totalorder %s20_s15, 4   ;;  %s342_s14 = smov %s344_s16 }
  0x1c   :  { %19 = sbr.rel (!%p17_p5) target bundleno = 8 (0x8), region = 54 }

</bundles_post_ra>
